<compile_context>
chip_gen: v7x
topology: tpu7x:2x2x1
jax: 0.10.0
libtpu: 0.0.40
codegen_flags: <defaults>
</compile_context>

<pallas_src>
import jax
import jax.numpy as jnp
from jax.experimental import pallas as pl
from jax.experimental.pallas import tpu as pltpu

IN_CH = 90      # ChebConv(90, hidden)
HIDDEN = 32     # hidden_channels
K_CHEB = 3      # Chebyshev order K=3
K_SORT = 70     # global_sort_pool k


# ----------------------------- Pallas kernels -----------------------------

def _fused_cheb_kernel(L_ref, x_ref, w1_ref, b1_ref, w2_ref, b2_ref,
                       xt_ref, h2_ref):
    """Per-graph fused ChebConv1 -> ReLU -> ChebConv2.

    L_ref: [N_per, N_per] scaled Laplacian of this graph (leading batch dim squeezed).
    x_ref: [N_per, Fin] node features of this graph.
    w1_ref: [3, Fin, H], b1_ref: [1, H]   (conv1 params)
    w2_ref: [3, H,  H],  b2_ref: [1, H]   (conv2 params)
    xt_ref: [N_per, H]  pre-ReLU conv1 output (x_train)
    h2_ref: [N_per, H]  conv2 output
    """
    L = L_ref[...]
    x = x_ref[...]

    # ---- conv1: T0 = x, T1 = L x, T2 = 2 L T1 - T0 ; out = sum_k Tk Wk + b
    t1 = jnp.dot(L, x, preferred_element_type=jnp.float32)
    t2 = 2.0 * jnp.dot(L, t1, preferred_element_type=jnp.float32) - x
    h1 = (jnp.dot(x,  w1_ref[0], preferred_element_type=jnp.float32)
          + jnp.dot(t1, w1_ref[1], preferred_element_type=jnp.float32)
          + jnp.dot(t2, w1_ref[2], preferred_element_type=jnp.float32)
          + b1_ref[...])
    xt_ref[...] = h1                      # x_train = conv1 output before ReLU

    # ---- fused ReLU + conv2 on the VMEM-resident intermediate (no HBM round-trip)
    xr = jnp.maximum(h1, 0.0)
    s1 = jnp.dot(L, xr, preferred_element_type=jnp.float32)
    s2 = 2.0 * jnp.dot(L, s1, preferred_element_type=jnp.float32) - xr
    h2_ref[...] = (jnp.dot(xr, w2_ref[0], preferred_element_type=jnp.float32)
                   + jnp.dot(s1, w2_ref[1], preferred_element_type=jnp.float32)
                   + jnp.dot(s2, w2_ref[2], preferred_element_type=jnp.float32)
                   + b2_ref[...])


def fused_cheb_convs(L_b, x_b, w1, b1, w2, b2):
    """L_b: [B,Np,Np], x_b: [B,Np,Fin], w1: [3,Fin,H], b1: [1,H], w2: [3,H,H], b2: [1,H].

    Returns (x_train_b [B,Np,H], h2_b [B,Np,H]).  grid=(B,) over graphs; block-diagonal
    structure of the batched Laplacian is exploited (no dense [B*Np, B*Np] matmul).
    """
    B, Np, Fin = x_b.shape
    H = w1.shape[-1]

    def replicated(a):
        nd = a.ndim
        return pl.BlockSpec(a.shape, lambda b, _nd=nd: (0,) * _nd)

    out_shapes = (jax.ShapeDtypeStruct((B, Np, H), jnp.float32),
                  jax.ShapeDtypeStruct((B, Np, H), jnp.float32))

    return pl.pallas_call(
        _fused_cheb_kernel,
        out_shape=out_shapes,
        grid=(B,),
        in_specs=[
            pl.BlockSpec((None, Np, Np), lambda b: (b, 0, 0)),   # L block of graph b
            pl.BlockSpec((None, Np, Fin), lambda b: (b, 0, 0)),  # x block of graph b
            replicated(w1), replicated(b1),
            replicated(w2), replicated(b2),
        ],
        out_specs=(
            pl.BlockSpec((None, Np, H), lambda b: (b, 0, 0)),
            pl.BlockSpec((None, Np, H), lambda b: (b, 0, 0)),
        ),
        compiler_params=pltpu.CompilerParams(
            dimension_semantics=("parallel",)),   # 2x on v7x (2 TCs); neutral on v5e/v6e
    )(L_b, x_b, w1, b1, w2, b2)


def _head_kernel(p_ref, w1_ref, b1_ref, w2t_ref, b2_ref, o_ref):
    """lin1 (MXU) -> lin2 + sigmoid (VPU broadcast-mul + lane reduce)."""
    h = jnp.dot(p_ref[...], w1_ref[...], preferred_element_type=jnp.float32) + b1_ref[...]
    y = jnp.sum(h * w2t_ref[...], axis=-1, keepdims=True) + b2_ref[...]
    o_ref[...] = jax.nn.sigmoid(y)


def mlp_head(pooled, w1, b1, w2, b2):
    """pooled: [B, k*H] -> [B, 1]."""
    B = pooled.shape[0]
    w2t = w2.reshape(1, -1)               # [H,1] -> [1,H] for the VPU broadcast path
    args = (pooled, w1, b1, w2t, b2)
    return pl.pallas_call(
        _head_kernel,
        out_shape=jax.ShapeDtypeStruct((B, 1), jnp.float32),
        in_specs=[pl.BlockSpec(a.shape, lambda: (0, 0)) for a in args],
        out_specs=pl.BlockSpec((B, 1), lambda: (0, 0)),
    )(*args)


# ------------------------------- JAX glue ---------------------------------

def build_scaled_laplacian_blocks(key, batch_size, nodes_per_graph, edge_prob=0.15):
    """Per-graph scaled Laplacian L_hat = -D^{-1/2} A D^{-1/2}
    (PyG ChebConv sym normalization, lambda_max = 2.0) -> [B, Np, Np]."""
    blocks = []
    for _ in range(batch_size):
        key, sub = jax.random.split(key)
        u = jax.random.uniform(sub, (nodes_per_graph, nodes_per_graph))
        a = jnp.triu((u < edge_prob).astype(jnp.float32), k=1)
        a = a + a.T
        deg = a.sum(axis=1)
        d_inv_sqrt = jnp.where(deg > 0.0, 1.0 / jnp.sqrt(jnp.maximum(deg, 1e-12)), 0.0)
        blocks.append(-(d_inv_sqrt[:, None] * a * d_inv_sqrt[None, :]))
    return jnp.stack(blocks, axis=0)


def global_sort_pool(xb, k):
    """Sort nodes of each graph by the last channel (descending), keep top-k, flatten."""
    # TODO(synk): argsort/gather has no clean Pallas TPU equivalent; done in plain JAX.
    B, Np, C = xb.shape
    order = jnp.argsort(-xb[..., -1], axis=1)[:, :k]             # descending by last feature
    topk = jnp.take_along_axis(xb, order[..., None], axis=1)     # [B, k, C]
    return topk.reshape(B, k * C)


def chebnet_forward(params, L_b, x_b):
    """Returns (out, x_train) matching the PyTorch forward (eval mode: dropout = identity)."""
    x_train_b, h2_b = fused_cheb_convs(
        L_b, x_b,
        params["w_conv1"], params["b_conv1"],
        params["w_conv2"], params["b_conv2"])
    pooled = global_sort_pool(h2_b, K_SORT)
    # F.dropout(p=0.5, training=False) -> identity in inference.
    out = mlp_head(pooled, params["w_lin1"], params["b_lin1"],
                   params["w_lin2"], params["b_lin2"])
    B, Np, H = x_train_b.shape
    return jnp.squeeze(out), x_train_b.reshape(B * Np, H)


# --------------------------------- main ------------------------------------

if __name__ == "__main__":
    B, N_PER = 2, 90                 # 2 graphs, 90 nodes each (>= k=70)
    N = B * N_PER

    key = jax.random.PRNGKey(0)
    ks = jax.random.split(key, 11)

    x = jax.random.normal(ks[0], (N, IN_CH), dtype=jnp.float32)
    L_b = build_scaled_laplacian_blocks(ks[1], B, N_PER)

    params = {
        "w_conv1": 0.1 * jax.random.normal(ks[2], (K_CHEB, IN_CH, HIDDEN), jnp.float32),
        "b_conv1": 0.1 * jax.random.normal(ks[3], (1, HIDDEN), jnp.float32),
        "w_conv2": 0.1 * jax.random.normal(ks[4], (K_CHEB, HIDDEN, HIDDEN), jnp.float32),
        "b_conv2": 0.1 * jax.random.normal(ks[5], (1, HIDDEN), jnp.float32),
        "w_lin1": 0.02 * jax.random.normal(ks[6], (HIDDEN * K_SORT, HIDDEN), jnp.float32),
        "b_lin1": 0.02 * jax.random.normal(ks[7], (1, HIDDEN), jnp.float32),
        "w_lin2": 0.1 * jax.random.normal(ks[8], (HIDDEN, 1), jnp.float32),
        "b_lin2": 0.1 * jax.random.normal(ks[9], (1, 1), jnp.float32),
    }

    out, x_train = chebnet_forward(params, L_b, x.reshape(B, N_PER, IN_CH))
    jax.block_until_ready((out, x_train))
    assert out.shape == (B,) and x_train.shape == (N, HIDDEN)
    print("KERNEL_OK")
</pallas_src>

<mosaic_0001>
module attributes {stable_mosaic.version = 11 : i64} {
  func.func @_fused_cheb_kernel(%arg0: i32, %arg1: memref<1x90x90xf32, #tpu.memory_space<vmem>>, %arg2: memref<1x90x90xf32, #tpu.memory_space<vmem>>, %arg3: memref<3x90x32xf32, #tpu.memory_space<vmem>>, %arg4: memref<1x32xf32, #tpu.memory_space<vmem>>, %arg5: memref<3x32x32xf32, #tpu.memory_space<vmem>>, %arg6: memref<1x32xf32, #tpu.memory_space<vmem>>, %arg7: memref<1x90x32xf32, #tpu.memory_space<vmem>>, %arg8: memref<1x90x32xf32, #tpu.memory_space<vmem>>) attributes {dimension_semantics = [#tpu.dimension_semantics<parallel>], iteration_bounds = array<i64: 2>, scalar_prefetch = 0 : i64, scratch_operands = 0 : i64, tpu.core_type = #tpu.core_type<tc>, window_params = [{transform_indices = @transform_0, window_bounds = array<i64: 1, 90, 90>}, {transform_indices = @transform_1, window_bounds = array<i64: 1, 90, 90>}, {pipeline_mode = #tpu.pipeline_mode<synchronous>, transform_indices = @transform_2, window_bounds = array<i64: 3, 90, 32>}, {pipeline_mode = #tpu.pipeline_mode<synchronous>, transform_indices = @transform_3, window_bounds = array<i64: 1, 32>}, {pipeline_mode = #tpu.pipeline_mode<synchronous>, transform_indices = @transform_4, window_bounds = array<i64: 3, 32, 32>}, {pipeline_mode = #tpu.pipeline_mode<synchronous>, transform_indices = @transform_5, window_bounds = array<i64: 1, 32>}, {transform_indices = @transform_6, window_bounds = array<i64: 1, 90, 32>}, {transform_indices = @transform_7, window_bounds = array<i64: 1, 90, 32>}]} {
    %c0 = arith.constant 0 : index
    %c0_0 = arith.constant 0 : index
    %c0_1 = arith.constant 0 : index
    %0 = vector.load %arg1[%c0, %c0_0, %c0_1] : memref<1x90x90xf32, #tpu.memory_space<vmem>>, vector<1x90x90xf32>
    %1 = vector.shape_cast %0 : vector<1x90x90xf32> to vector<90x90xf32>
    %c0_2 = arith.constant 0 : index
    %c0_3 = arith.constant 0 : index
    %c0_4 = arith.constant 0 : index
    %2 = vector.load %arg2[%c0_2, %c0_3, %c0_4] : memref<1x90x90xf32, #tpu.memory_space<vmem>>, vector<1x90x90xf32>
    %3 = vector.shape_cast %2 : vector<1x90x90xf32> to vector<90x90xf32>
    %cst = arith.constant dense<0.000000e+00> : vector<90x90xf32>
    %4 = tpu.matmul %1, %3, %cst {dimension_numbers = #tpu.dot_dimension_numbers<[1], [0], [0], [1], [0, 0, 1, 1], [], []>} : vector<90x90xf32>, vector<90x90xf32>, vector<90x90xf32> -> vector<90x90xf32>
    %cst_5 = arith.constant dense<0.000000e+00> : vector<90x90xf32>
    %5 = tpu.matmul %1, %4, %cst_5 {dimension_numbers = #tpu.dot_dimension_numbers<[1], [0], [0], [1], [0, 0, 1, 1], [], []>} : vector<90x90xf32>, vector<90x90xf32>, vector<90x90xf32> -> vector<90x90xf32>
    %cst_6 = arith.constant 2.000000e+00 : f32
    %6 = vector.broadcast %cst_6 : f32 to vector<90x90xf32>
    %7 = arith.mulf %6, %5 : vector<90x90xf32>
    %8 = arith.subf %7, %3 : vector<90x90xf32>
    %c0_7 = arith.constant 0 : index
    %c0_8 = arith.constant 0 : index
    %c0_9 = arith.constant 0 : index
    %9 = vector.load %arg3[%c0_7, %c0_8, %c0_9] : memref<3x90x32xf32, #tpu.memory_space<vmem>>, vector<1x90x32xf32>
    %10 = vector.shape_cast %9 : vector<1x90x32xf32> to vector<90x32xf32>
    %cst_10 = arith.constant dense<0.000000e+00> : vector<90x32xf32>
    %11 = tpu.matmul %3, %10, %cst_10 {dimension_numbers = #tpu.dot_dimension_numbers<[1], [0], [0], [1], [0, 0, 1, 1], [], []>} : vector<90x90xf32>, vector<90x32xf32>, vector<90x32xf32> -> vector<90x32xf32>
    %c1 = arith.constant 1 : index
    %c0_11 = arith.constant 0 : index
    %c0_12 = arith.constant 0 : index
    %12 = vector.load %arg3[%c1, %c0_11, %c0_12] : memref<3x90x32xf32, #tpu.memory_space<vmem>>, vector<1x90x32xf32>
    %13 = vector.shape_cast %12 : vector<1x90x32xf32> to vector<90x32xf32>
    %cst_13 = arith.constant dense<0.000000e+00> : vector<90x32xf32>
    %14 = tpu.matmul %4, %13, %cst_13 {dimension_numbers = #tpu.dot_dimension_numbers<[1], [0], [0], [1], [0, 0, 1, 1], [], []>} : vector<90x90xf32>, vector<90x32xf32>, vector<90x32xf32> -> vector<90x32xf32>
    %15 = arith.addf %11, %14 : vector<90x32xf32>
    %c2 = arith.constant 2 : index
    %c0_14 = arith.constant 0 : index
    %c0_15 = arith.constant 0 : index
    %16 = vector.load %arg3[%c2, %c0_14, %c0_15] : memref<3x90x32xf32, #tpu.memory_space<vmem>>, vector<1x90x32xf32>
    %17 = vector.shape_cast %16 : vector<1x90x32xf32> to vector<90x32xf32>
    %cst_16 = arith.constant dense<0.000000e+00> : vector<90x32xf32>
    %18 = tpu.matmul %8, %17, %cst_16 {dimension_numbers = #tpu.dot_dimension_numbers<[1], [0], [0], [1], [0, 0, 1, 1], [], []>} : vector<90x90xf32>, vector<90x32xf32>, vector<90x32xf32> -> vector<90x32xf32>
    %19 = arith.addf %15, %18 : vector<90x32xf32>
    %c0_17 = arith.constant 0 : index
    %c0_18 = arith.constant 0 : index
    %20 = vector.load %arg4[%c0_17, %c0_18] : memref<1x32xf32, #tpu.memory_space<vmem>>, vector<1x32xf32>
    %21 = vector.broadcast %20 : vector<1x32xf32> to vector<90x32xf32>
    %22 = arith.addf %19, %21 : vector<90x32xf32>
    %c0_19 = arith.constant 0 : index
    %c0_20 = arith.constant 0 : index
    %c0_21 = arith.constant 0 : index
    %23 = vector.load %arg7[%c0_19, %c0_20, %c0_21] : memref<1x90x32xf32, #tpu.memory_space<vmem>>, vector<1x90x32xf32>
    %24 = vector.shape_cast %23 : vector<1x90x32xf32> to vector<90x32xf32>
    %25 = vector.shape_cast %22 : vector<90x32xf32> to vector<1x90x32xf32>
    tpu.vector_store %arg7[%c0_19, %c0_20, %c0_21], %25 {strides = array<i32>} : memref<1x90x32xf32, #tpu.memory_space<vmem>>, vector<1x90x32xf32>,
    %cst_22 = arith.constant 0.000000e+00 : f32
    %26 = vector.broadcast %cst_22 : f32 to vector<90x32xf32>
    %27 = arith.maximumf %22, %26 : vector<90x32xf32>
    %cst_23 = arith.constant dense<0.000000e+00> : vector<90x32xf32>
    %28 = tpu.matmul %1, %27, %cst_23 {dimension_numbers = #tpu.dot_dimension_numbers<[1], [0], [0], [1], [0, 0, 1, 1], [], []>} : vector<90x90xf32>, vector<90x32xf32>, vector<90x32xf32> -> vector<90x32xf32>
    %cst_24 = arith.constant dense<0.000000e+00> : vector<90x32xf32>
    %29 = tpu.matmul %1, %28, %cst_24 {dimension_numbers = #tpu.dot_dimension_numbers<[1], [0], [0], [1], [0, 0, 1, 1], [], []>} : vector<90x90xf32>, vector<90x32xf32>, vector<90x32xf32> -> vector<90x32xf32>
    %cst_25 = arith.constant 2.000000e+00 : f32
    %30 = vector.broadcast %cst_25 : f32 to vector<90x32xf32>
    %31 = arith.mulf %30, %29 : vector<90x32xf32>
    %32 = arith.subf %31, %27 : vector<90x32xf32>
    %c0_26 = arith.constant 0 : index
    %c0_27 = arith.constant 0 : index
    %c0_28 = arith.constant 0 : index
    %33 = vector.load %arg5[%c0_26, %c0_27, %c0_28] : memref<3x32x32xf32, #tpu.memory_space<vmem>>, vector<1x32x32xf32>
    %34 = vector.shape_cast %33 : vector<1x32x32xf32> to vector<32x32xf32>
    %cst_29 = arith.constant dense<0.000000e+00> : vector<90x32xf32>
    %35 = tpu.matmul %27, %34, %cst_29 {dimension_numbers = #tpu.dot_dimension_numbers<[1], [0], [0], [1], [0, 0, 1, 1], [], []>} : vector<90x32xf32>, vector<32x32xf32>, vector<90x32xf32> -> vector<90x32xf32>
    %c1_30 = arith.constant 1 : index
    %c0_31 = arith.constant 0 : index
    %c0_32 = arith.constant 0 : index
    %36 = vector.load %arg5[%c1_30, %c0_31, %c0_32] : memref<3x32x32xf32, #tpu.memory_space<vmem>>, vector<1x32x32xf32>
    %37 = vector.shape_cast %36 : vector<1x32x32xf32> to vector<32x32xf32>
    %cst_33 = arith.constant dense<0.000000e+00> : vector<90x32xf32>
    %38 = tpu.matmul %28, %37, %cst_33 {dimension_numbers = #tpu.dot_dimension_numbers<[1], [0], [0], [1], [0, 0, 1, 1], [], []>} : vector<90x32xf32>, vector<32x32xf32>, vector<90x32xf32> -> vector<90x32xf32>
    %39 = arith.addf %35, %38 : vector<90x32xf32>
    %c2_34 = arith.constant 2 : index
    %c0_35 = arith.constant 0 : index
    %c0_36 = arith.constant 0 : index
    %40 = vector.load %arg5[%c2_34, %c0_35, %c0_36] : memref<3x32x32xf32, #tpu.memory_space<vmem>>, vector<1x32x32xf32>
    %41 = vector.shape_cast %40 : vector<1x32x32xf32> to vector<32x32xf32>
    %cst_37 = arith.constant dense<0.000000e+00> : vector<90x32xf32>
    %42 = tpu.matmul %32, %41, %cst_37 {dimension_numbers = #tpu.dot_dimension_numbers<[1], [0], [0], [1], [0, 0, 1, 1], [], []>} : vector<90x32xf32>, vector<32x32xf32>, vector<90x32xf32> -> vector<90x32xf32>
    %43 = arith.addf %39, %42 : vector<90x32xf32>
    %c0_38 = arith.constant 0 : index
    %c0_39 = arith.constant 0 : index
    %44 = vector.load %arg6[%c0_38, %c0_39] : memref<1x32xf32, #tpu.memory_space<vmem>>, vector<1x32xf32>
    %45 = vector.broadcast %44 : vector<1x32xf32> to vector<90x32xf32>
    %46 = arith.addf %43, %45 : vector<90x32xf32>
    %c0_40 = arith.constant 0 : index
    %c0_41 = arith.constant 0 : index
    %c0_42 = arith.constant 0 : index
    %47 = vector.load %arg8[%c0_40, %c0_41, %c0_42] : memref<1x90x32xf32, #tpu.memory_space<vmem>>, vector<1x90x32xf32>
    %48 = vector.shape_cast %47 : vector<1x90x32xf32> to vector<90x32xf32>
    %49 = vector.shape_cast %46 : vector<90x32xf32> to vector<1x90x32xf32>
    tpu.vector_store %arg8[%c0_40, %c0_41, %c0_42], %49 {strides = array<i32>} : memref<1x90x32xf32, #tpu.memory_space<vmem>>, vector<1x90x32xf32>,
    return
  }
  func.func @transform_0(%arg0: i32) -> (i32, i32, i32) {
    %c0_i32 = arith.constant 0 : i32
    %c0_i32_0 = arith.constant 0 : i32
    %c0_i32_1 = arith.constant 0 : i32
    return %arg0, %c0_i32, %c0_i32_0 : i32, i32, i32
  }
  func.func @transform_1(%arg0: i32) -> (i32, i32, i32) {
    %c0_i32 = arith.constant 0 : i32
    %c0_i32_0 = arith.constant 0 : i32
    %c0_i32_1 = arith.constant 0 : i32
    return %arg0, %c0_i32, %c0_i32_0 : i32, i32, i32
  }
  func.func @transform_2(%arg0: i32) -> (i32, i32, i32) {
    %c0_i32 = arith.constant 0 : i32
    %c0_i32_0 = arith.constant 0 : i32
    %c0_i32_1 = arith.constant 0 : i32
    %c0_i32_2 = arith.constant 0 : i32
    return %c0_i32, %c0_i32_0, %c0_i32_1 : i32, i32, i32
  }
  func.func @transform_3(%arg0: i32) -> (i32, i32) {
    %c0_i32 = arith.constant 0 : i32
    %c0_i32_0 = arith.constant 0 : i32
    %c0_i32_1 = arith.constant 0 : i32
    return %c0_i32, %c0_i32_0 : i32, i32
  }
  func.func @transform_4(%arg0: i32) -> (i32, i32, i32) {
    %c0_i32 = arith.constant 0 : i32
    %c0_i32_0 = arith.constant 0 : i32
    %c0_i32_1 = arith.constant 0 : i32
    %c0_i32_2 = arith.constant 0 : i32
    return %c0_i32, %c0_i32_0, %c0_i32_1 : i32, i32, i32
  }
  func.func @transform_5(%arg0: i32) -> (i32, i32) {
    %c0_i32 = arith.constant 0 : i32
    %c0_i32_0 = arith.constant 0 : i32
    %c0_i32_1 = arith.constant 0 : i32
    return %c0_i32, %c0_i32_0 : i32, i32
  }
  func.func @transform_6(%arg0: i32) -> (i32, i32, i32) {
    %c0_i32 = arith.constant 0 : i32
    %c0_i32_0 = arith.constant 0 : i32
    %c0_i32_1 = arith.constant 0 : i32
    return %arg0, %c0_i32, %c0_i32_0 : i32, i32, i32
  }
  func.func @transform_7(%arg0: i32) -> (i32, i32, i32) {
    %c0_i32 = arith.constant 0 : i32
    %c0_i32_0 = arith.constant 0 : i32
    %c0_i32_1 = arith.constant 0 : i32
    return %arg0, %c0_i32, %c0_i32_0 : i32, i32, i32
  }
}

</mosaic_0001>

<bundles_post_ra>
// kernel: tpu_custom_call.1
= control target key start
LH: loop header
LB: loop body
LE: loop exit
PB: predicated region body
PF: predicated region fallthrough
CT: control target
= control target key end

     0   :  { %s3230_s24 = smov 0   ;;  %s3871_s0 = inlined_call_operand.vmem [shape: f32[2,90,90], index: 0, kind: input, shape index: {}]   ;;  %s3872_s1 = inlined_call_operand.vmem [shape: f32[2,90,90], index: 1, kind: input, shape index: {}]   ;;  %s3873_s2 = inlined_call_operand.vmem [shape: f32[3,90,32], index: 2, kind: input, shape index: {}]   ;;  %s3874_s3 = inlined_call_operand.vmem [shape: f32[1,32], index: 3, kind: input, shape index: {}]   ;;  %s3875_s4 = inlined_call_operand.vmem [shape: f32[3,32,32], index: 4, kind: input, shape index: {}]   ;;  %s3876_s5 = inlined_call_operand.vmem [shape: f32[1,32], index: 5, kind: input, shape index: {}]   ;;  %s3877_s6 = inlined_call_operand.vmem [shape: f32[2,90,32], index: 6, kind: output, shape index: {0}]   ;;  %s3878_s7 = inlined_call_operand.vmem [shape: f32[2,90,32], index: 7, kind: output, shape index: {1}]  }
   0x1 LB: > { %s2157_s25 = sadd.s32 4294967295, %s3187_s24   ;;  %p2161_p0 = scmp.ge.s32.totalorder %s3187_s24, 1  ;;  %s3187_s24 = sphi %s3230_s24, %s18_s24  }
   0x2   : > { %p250_p1 = scmp.lt.s32.totalorder %s3187_s24, 3 }
   0x4   : > { %p251_p2 = pnand %p2161_p0, %p250_p1 }
   0x5   : > { %p292_p3 = scmp.lt.s32.totalorder (!%p251_p2), %s2157_s25, 1  ;;  %vm336_vm0 = vcmask (!%p251_p2), 736256   ;;  %vm373_vm1 = vcmask (!%p251_p2), 1041408   ;;  %vm3189_vm2 = vmmov (!%p251_p2), 1   ;;  %v2192_v46 = vld [vmem:[%s3873_s2 + $0x60] sm:$0xff] (!%p251_p2)  ;;  %v2193_v47 = vld [vmem:[%s3873_s2 + $0x68] sm:$0xff] (!%p251_p2) }
   0x6   : > { %254 = sbr.rel (%p251_p2) target bundleno = 1437 (0x59d), region = 44  ;;  %vm3293_vm3 = vmpackc.low (!%p251_p2), %vm373_vm1, %vm3189_vm2  ;;  %v2969_v51 = vpack.c.bf16 (!%p251_p2), %v2193_v47, %v2192_v46  ;;  %v2194_v52 = vld [vmem:[%s3873_s2 + $0x70] sm:$0xff] (!%p251_p2)  ;;  %v2195_v53 = vld [vmem:[%s3873_s2 + $0x78] sm:$0xff] (!%p251_p2)  ;;  %vm1213_vm4 = vcmask (!%p251_p2), 261120   ;;  %vm1225_vm5 = vcmask (!%p251_p2), 254976  }
   0x7   : > { %v2973_v54 = vpack.c.bf16 (!%p251_p2), %v2195_v53, %v2194_v52  ;;  %v2196_v55 = vld [vmem:[%s3873_s2 + $0x80] sm:$0xff] (!%p251_p2)  ;;  %v2197_v56 = vld [vmem:[%s3873_s2 + $0x88] sm:$0xff] (!%p251_p2)  ;;  %v2198_v58 = vld [vmem:[%s3873_s2 + $0x90] sm:$0xff] (!%p251_p2) }
   0x8   : > { %v2977_v57 = vpack.c.bf16 (!%p251_p2), %v2197_v56, %v2196_v55  ;;  %v2199_v59 = vld [vmem:[%s3873_s2 + $0x98] sm:$0xff] (!%p251_p2)  ;;  %v2200_v61 = vld [vmem:[%s3873_s2 + $0xa0] sm:$0xff] (!%p251_p2)  ;;  %v2201_v62 = vld [vmem:[%s3873_s2 + $0xa8] sm:$0xff] (!%p251_p2) }
   0x9   : > { %v2981_v60 = vpack.c.bf16 (!%p251_p2), %v2199_v59, %v2198_v58  ;;  %v2985_v63 = vpack.c.bf16 (!%p251_p2), %v2201_v62, %v2200_v61  ;;  %v661_v47 = vld [vmem:[%s3873_s2 + $0x38] sm:$0xff] (!%p251_p2)  ;;  %v2231_v52 = vld [vmem:[%s3873_s2 + $0xc8] sm:$0xff] (!%p251_p2)  ;;  %v2236_v55 = vld [vmem:[%s3873_s2 + $0xf0] sm:$0xff] (!%p251_p2) }
   0xa   : > { %v2233_v53 = vld [vmem:[%s3873_s2 + $0xd8] sm:$0xff] (!%p251_p2)  ;;  %v2238_v58 = vld [vmem:[%s3873_s2 + $0x100] sm:$0xff] (!%p251_p2)  ;;  %v2239_v59 = vld [vmem:[%s3873_s2 + $0x108] sm:$0xff] (!%p251_p2) }
   0xb   : > { %v2237_v56 = vld [vmem:[%s3873_s2 + $0xf8] sm:$0xff] (!%p251_p2)  ;;  %v2240_v61 = vld [vmem:[%s3873_s2 + $0x110] sm:$0xff] (!%p251_p2) }
   0xc   : > { %v2241_v62 = vld [vmem:[%s3873_s2 + $0x118] sm:$0x3] (!%p251_p2) }
   0xd   : > { %s3882_s25 = smov (!%p292_p3, %s2157_s25), 1 }
   0xe   : > { %s3238_s26 = smul.u32 96, %s3882_s25 }
  0x10   : > { %s301_s29 = scalar_lea.vmem %s3872_s1, %s3238_s26  ;;  %s3258_s9 = scalar_lea.vmem %s3871_s0, %s3238_s26 }
  0x11   : > { %v3244_v0 = vld [vmem:[%s301_s29] sm:$0xff]  ;;  %v3246_v1 = vld [vmem:[%s301_s29 + $0x8] sm:$0xff]  ;;  %v3248_v2 = vld [vmem:[%s301_s29 + $0x10] sm:$0xff]  ;;  %s3619_s23 = scalar_lea.vmem %s3877_s6, %s3238_s26  ;;  %s3842_s10 = scalar_lea.vmem %s3878_s7, %s3238_s26 }
  0x12   : > { %v2917_v3 = vpack.c.bf16 %v3246_v1, %v3244_v0  ;;  %v3252_v4 = vld [vmem:[%s301_s29 + $0x18] sm:$0xff]  ;;  %v3262_v6 = vld [vmem:[%s301_s29 + $0x20] sm:$0xff]  ;;  %v3264_v7 = vld [vmem:[%s301_s29 + $0x28] sm:$0xff] }
  0x13   : > { %v2921_v5 = vpack.c.bf16 %v3252_v4, %v3248_v2  ;;  %v3267_v8 = vld [vmem:[%s3258_s9] sm:$0xff]  ;;  %v2925_v9 = vpack.c.bf16 %v3264_v7, %v3262_v6  ;;  %v3273_v10 = vld [vmem:[%s301_s29 + $0x30] sm:$0xff]  ;;  %v3275_v11 = vld [vmem:[%s301_s29 + $0x38] sm:$0xff] }
  0x14   : > { %2918 = vmatprep.subr.bf16.mxu0 %v2917_v3  ;;  %2569 = vmatprep.mubr.msk.f32.mxu0 %vm336_vm0, %v3267_v8  ;;  %v2929_v12 = vpack.c.bf16 %v3275_v11, %v3273_v10  ;;  %v3281_v13 = vld [vmem:[%s301_s29 + $0x40] sm:$0xff]  ;;  %v3283_v14 = vld [vmem:[%s301_s29 + $0x48] sm:$0xff]  ;;  %v3287_v16 = vld [vmem:[%s301_s29 + $0x50] sm:$0xff] }
  0x15   : > { %2920 = vmatpush3.bf16.msra.mxu0 %v2917_v3  ;;  %2779 = vmatprep.mubr.msk.f32.mxu1 %vm336_vm0, %v3267_v8  ;;  %v2933_v15 = vpack.c.bf16 %v3283_v14, %v3281_v13  ;;  %v3289_v17 = vld [vmem:[%s301_s29 + $0x58] sm:$0x3]  ;;  %v3302_v20 = vld [vmem:[%s3258_s9 + $0x8] sm:$0xff]  ;;  %v3305_v21 = vld [vmem:[%s3258_s9 + $0x10] sm:$0xff] }
  0x16   : > { %2922 = vmatprep.subr.bf16.mxu0 %v2921_v5  ;;  %v2937_v18 = vpack.c.bf16 %v3289_v17, %v3287_v16  ;;  %v3312_v22 = vld [vmem:[%s3258_s9 + $0x18] sm:$0xff]  ;;  %v3315_v23 = vld [vmem:[%s3258_s9 + $0x20] sm:$0xff]  ;;  %v3322_v24 = vld [vmem:[%s3258_s9 + $0x28] sm:$0xff] }
  0x17   : > { %v3325_v25 = vld [vmem:[%s3258_s9 + $0x30] sm:$0xff]  ;;  %v3332_v26 = vld [vmem:[%s3258_s9 + $0x38] sm:$0xff]  ;;  %v3335_v27 = vld [vmem:[%s3258_s9 + $0x40] sm:$0xff] }
  0x18   : > { %v3342_v28 = vld [vmem:[%s3258_s9 + $0x48] sm:$0xff]  ;;  %v3345_v29 = vld [vmem:[%s3258_s9 + $0x50] sm:$0xff]  ;;  %v3352_v30 = vld [vmem:[%s3258_s9 + $0x58] sm:$0x3] }
  0x19   : > { %2924 = vmatpush3.bf16.msra.mxu0 %v2921_v5  ;;  %v2202_v3 = vld [vmem:[%s3873_s2 + $0xb0] sm:$0xff]  ;;  %v2203_v5 = vld [vmem:[%s3873_s2 + $0xb8] sm:$0x3] }
  0x1a   : > { %2926 = vmatprep.subr.bf16.mxu0 %v2925_v9 }
  0x1d   : > { %2928 = vmatpush3.bf16.msra.mxu0 %v2925_v9  ;;  %v2989_v9 = vpack.c.bf16 %v2203_v5, %v2202_v3 }
  0x1e   : > { %2930 = vmatprep.subr.bf16.mxu0 %v2929_v12 }
  0x21   : > { %2932 = vmatpush3.bf16.msra.mxu0 %v2929_v12  ;;  %v654_v12 = vld [vmem:[%s3873_s2] sm:$0xff] }
  0x22   : > { %2934 = vmatprep.subr.bf16.mxu0 %v2933_v15 }
  0x25   : > { %2936 = vmatpush3.bf16.msra.mxu0 %v2933_v15  ;;  %v655_v15 = vld [vmem:[%s3873_s2 + $0x8] sm:$0xff] }
  0x26   : > { %2939 = vmatprep.subr.msk.bf16.mxu0 %vm3293_vm3, %v2937_v18 }
  0x29   : > { %2942 = vmatpush3.bf16.msk.msra.mxu0 %vm3293_vm3, %v2937_v18  ;;  %v2995_v18 = vpack.c.bf16 %v655_v15, %v654_v12 }
  0x2c   : > { %2570 = vmatmul.mubr.msk.f32.vlgmr.msra.gmra.mrb[0].mxu0 %vm336_vm0, %v3302_v20 }
  0x2d   : > { %2572 = vmatprep.mubr.msk.f32.mxu0 %vm336_vm0, %v3305_v21 }
  0x30   : > { %2573 = vmatmul.mubr.msk.f32.gmra.mrb[2].mxu0 %vm336_vm0, %v3312_v22 }
  0x31   : > { %2575 = vmatprep.mubr.msk.f32.mxu0 %vm336_vm0, %v3315_v23 }
  0x34   : > { %2576 = vmatmul.mubr.msk.f32.gmra.mrb[4].mxu0 %vm336_vm0, %v3322_v24 }
  0x35   : > { %2578 = vmatprep.mubr.msk.f32.mxu0 %vm336_vm0, %v3325_v25 }
  0x38   : > { %2579 = vmatmul.mubr.msk.f32.gmra.mrb[6].mxu0 %vm336_vm0, %v3332_v26 }
  0x39   : > { %2581 = vmatprep.mubr.msk.f32.mxu0 %vm336_vm0, %v3335_v27 }
  0x3c   : > { %2582 = vmatmul.mubr.msk.f32.gmra.mrb[8].mxu0 %vm336_vm0, %v3342_v28 }
  0x3d   : > { %2584 = vmatprep.mubr.msk.f32.mxu0 %vm336_vm0, %v3345_v29 }
  0x40   : > { %2585 = vmatmul.mubr.msk.f32.gmra.mrb[10].mxu0 %vm336_vm0, %v3352_v30 }
  0x41   : > { %2611 = vmatprep.mubr.msk.f32.mxu0 %vm336_vm0, %v3267_v8 }
  0xff   : > { %v3358_v31 = vpop.f32.mrb[0].mxu0 }
 0x100   : > { %v3360_v32 = vpop.f32.mrb[1].mxu0 }
 0x101   : > { %v2943_v33 = vpack.c.bf16 %v3358_v31, %v3360_v32 }
 0x103   : > { %v3364_v34 = vpop.f32.mrb[2].mxu0  ;;  %2944 = vmatprep.subr.bf16.mxu0 %v2943_v33 }
 0x104   : > { %v3366_v35 = vpop.f32.mrb[3].mxu0  ;;  %2946 = vmatpush3.bf16.msra.mxu0 %v2943_v33  ;;  %v656_v33 = vld [vmem:[%s3873_s2 + $0x10] sm:$0xff] }
 0x105   : > { %v2947_v36 = vpack.c.bf16 %v3364_v34, %v3366_v35 }
 0x107   : > { %v3370_v37 = vpop.f32.mrb[4].mxu0  ;;  %2948 = vmatprep.subr.bf16.mxu0 %v2947_v36 }
 0x108   : > { %v3372_v38 = vpop.f32.mrb[5].mxu0  ;;  %2950 = vmatpush3.bf16.msra.mxu0 %v2947_v36  ;;  %v657_v36 = vld [vmem:[%s3873_s2 + $0x18] sm:$0xff] }
 0x109   : > { %v2951_v39 = vpack.c.bf16 %v3370_v37, %v3372_v38 }
 0x10b   : > { %v3376_v40 = vpop.f32.mrb[6].mxu0  ;;  %2952 = vmatprep.subr.bf16.mxu0 %v2951_v39 }
 0x10c   : > { %v3378_v41 = vpop.f32.mrb[7].mxu0  ;;  %2954 = vmatpush3.bf16.msra.mxu0 %v2951_v39  ;;  %v2999_v39 = vpack.c.bf16 %v657_v36, %v656_v33 }
 0x10d   : > { %v2955_v42 = vpack.c.bf16 %v3376_v40, %v3378_v41 }
 0x10f   : > { %v3382_v43 = vpop.f32.mrb[8].mxu0  ;;  %2956 = vmatprep.subr.bf16.mxu0 %v2955_v42 }
 0x110   : > { %v3384_v44 = vpop.f32.mrb[9].mxu0  ;;  %2958 = vmatpush3.bf16.msra.mxu0 %v2955_v42  ;;  %v658_v42 = vld [vmem:[%s3873_s2 + $0x20] sm:$0xff] }
 0x111   : > { %v2959_v45 = vpack.c.bf16 %v3382_v43, %v3384_v44 }
 0x113   : > { %v3394_v48 = vpop.f32.mrb[10].mxu0  ;;  %2960 = vmatprep.subr.bf16.mxu0 %v2959_v45 }
 0x114   : > { %v3396_v49 = vpop.f32.mrb[11].mxu0  ;;  %2962 = vmatpush3.bf16.msra.mxu0 %v2959_v45  ;;  %v659_v45 = vld [vmem:[%s3873_s2 + $0x28] sm:$0xff] }
 0x115   : > { %v2963_v50 = vpack.c.bf16 %v3394_v48, %v3396_v49  ;;  %v3003_v46 = vpack.c.bf16 %v659_v45, %v658_v42 }
 0x117   : > { %2965 = vmatprep.subr.msk.bf16.mxu0 %vm3293_vm3, %v2963_v50 }
 0x118   : > { %2968 = vmatpush3.bf16.msk.msra.mxu0 %vm3293_vm3, %v2963_v50  ;;  %v663_v50 = vld [vmem:[%s3873_s2 + $0x48] sm:$0xff] }
 0x119   : > { %2970 = vmatprep.subr.bf16.mxu0 %v2969_v51 }
 0x11b   : > { %2612 = vmatmul.mubr.msk.f32.vlgmr.msra.gmra.mrb[12].mxu0 %vm336_vm0, %v3302_v20 }
 0x11c   : > { %2972 = vmatpush3.bf16.msra.mxu0 %v2969_v51  ;;  %2614 = vmatprep.mubr.msk.f32.mxu0 %vm336_vm0, %v3305_v21  ;;  %v665_v51 = vld [vmem:[%s3873_s2 + $0x58] sm:$0x3] }
 0x11d   : > { %2974 = vmatprep.subr.bf16.mxu0 %v2973_v54 }
 0x11f   : > { %2615 = vmatmul.mubr.msk.f32.gmra.mrb[14].mxu0 %vm336_vm0, %v3312_v22 }
 0x120   : > { %2976 = vmatpush3.bf16.msra.mxu0 %v2973_v54  ;;  %2617 = vmatprep.mubr.msk.f32.mxu0 %vm336_vm0, %v3315_v23  ;;  %v2235_v54 = vld [vmem:[%s3873_s2 + $0xe8] sm:$0xff] }
 0x121   : > { %2978 = vmatprep.subr.bf16.mxu0 %v2977_v57 }
 0x123   : > { %2618 = vmatmul.mubr.msk.f32.gmra.mrb[16].mxu0 %vm336_vm0, %v3322_v24 }
 0x124   : > { %2980 = vmatpush3.bf16.msra.mxu0 %v2977_v57  ;;  %2620 = vmatprep.mubr.msk.f32.mxu0 %vm336_vm0, %v3325_v25  ;;  %v3033_v57 = vpack.c.bf16 %v2237_v56, %v2236_v55 }
 0x125   : > { %2982 = vmatprep.subr.bf16.mxu0 %v2981_v60 }
 0x127   : > { %2621 = vmatmul.mubr.msk.f32.gmra.mrb[18].mxu0 %vm336_vm0, %v3332_v26 }
 0x128   : > { %2984 = vmatpush3.bf16.msra.mxu0 %v2981_v60  ;;  %2623 = vmatprep.mubr.msk.f32.mxu0 %vm336_vm0, %v3335_v27  ;;  %v3037_v60 = vpack.c.bf16 %v2239_v59, %v2238_v58 }
 0x129   : > { %2986 = vmatprep.subr.bf16.mxu0 %v2985_v63 }
 0x12b   : > { %2624 = vmatmul.mubr.msk.f32.gmra.mrb[20].mxu0 %vm336_vm0, %v3342_v28 }
 0x12c   : > { %2988 = vmatpush3.bf16.msra.mxu0 %v2985_v63  ;;  %2626 = vmatprep.mubr.msk.f32.mxu0 %vm336_vm0, %v3345_v29  ;;  %v3041_v63 = vpack.c.bf16 %v2241_v62, %v2240_v61 }
 0x12d   : > { %2991 = vmatprep.subr.msk.bf16.mxu0 %vm3293_vm3, %v2989_v9 }
 0x12f   : > { %2627 = vmatmul.mubr.msk.f32.gmra.mrb[22].mxu0 %vm336_vm0, %v3352_v30 }
 0x130   : > { %2994 = vmatpush3.bf16.msk.msra.mxu0 %vm3293_vm3, %v2989_v9  ;;  %2653 = vmatprep.mubr.msk.f32.mxu0 %vm336_vm0, %v3360_v32  ;;  %v660_v32 = vld [vmem:[%s3873_s2 + $0x30] sm:$0xff] }
 0x131   : > { %2996 = vmatprep.subr.bf16.mxu0 %v2995_v18 }
 0x133   : > { %2654 = vmatmul.mubr.msk.f32.vlgmr.msra.gmra.mrb[24].mxu0 %vm336_vm0, %v3358_v31  ;;  %v3007_v31 = vpack.c.bf16 %v661_v47, %v660_v32 }
 0x134   : > { %2656 = vmatprep.mubr.msk.f32.mxu0 %vm336_vm0, %v3366_v35  ;;  %2998 = vmatpush3.bf16.msra.mxu0 %v2995_v18  ;;  %v662_v35 = vld [vmem:[%s3873_s2 + $0x40] sm:$0xff] }
 0x135   : > { %3000 = vmatprep.subr.bf16.mxu0 %v2999_v39 }
 0x137   : > { %2657 = vmatmul.mubr.msk.f32.gmra.mrb[26].mxu0 %vm336_vm0, %v3364_v34  ;;  %v3011_v34 = vpack.c.bf16 %v663_v50, %v662_v35 }
 0x138   : > { %2659 = vmatprep.mubr.msk.f32.mxu0 %vm336_vm0, %v3372_v38  ;;  %3002 = vmatpush3.bf16.msra.mxu0 %v2999_v39  ;;  %v664_v38 = vld [vmem:[%s3873_s2 + $0x50] sm:$0xff] }
 0x139   : > { %3004 = vmatprep.subr.bf16.mxu0 %v3003_v46 }
 0x13b   : > { %2660 = vmatmul.mubr.msk.f32.gmra.mrb[28].mxu0 %vm336_vm0, %v3370_v37  ;;  %v3015_v37 = vpack.c.bf16 %v665_v51, %v664_v38 }
 0x13c   : > { %2662 = vmatprep.mubr.msk.f32.mxu0 %vm336_vm0, %v3378_v41  ;;  %3006 = vmatpush3.bf16.msra.mxu0 %v3003_v46  ;;  %v2230_v41 = vld [vmem:[%s3873_s2 + $0xc0] sm:$0xff] }
 0x13d   : > { %3008 = vmatprep.subr.bf16.mxu0 %v3007_v31 }
 0x13f   : > { %2663 = vmatmul.mubr.msk.f32.gmra.mrb[30].mxu0 %vm336_vm0, %v3376_v40  ;;  %v3021_v40 = vpack.c.bf16 %v2231_v52, %v2230_v41 }
 0x140   : > { %2665 = vmatprep.mubr.msk.f32.mxu0 %vm336_vm0, %v3384_v44  ;;  %3010 = vmatpush3.bf16.msra.mxu0 %v3007_v31  ;;  %v2232_v44 = vld [vmem:[%s3873_s2 + $0xd0] sm:$0xff] }
 0x141   : > { %3012 = vmatprep.subr.bf16.mxu0 %v3011_v34 }
 0x143   : > { %2666 = vmatmul.mubr.msk.f32.gmra.mrb[32].mxu0 %vm336_vm0, %v3382_v43  ;;  %v3025_v43 = vpack.c.bf16 %v2233_v53, %v2232_v44 }
 0x144   : > { %2668 = vmatprep.mubr.msk.f32.mxu0 %vm336_vm0, %v3396_v49  ;;  %3014 = vmatpush3.bf16.msra.mxu0 %v3011_v34  ;;  %v2234_v49 = vld [vmem:[%s3873_s2 + $0xe0] sm:$0xff] }
 0x145   : > { %3017 = vmatprep.subr.msk.bf16.mxu0 %vm3293_vm3, %v3015_v37 }
 0x147   : > { %2669 = vmatmul.mubr.msk.f32.gmra.mrb[34].mxu0 %vm336_vm0, %v3394_v48  ;;  %v3029_v48 = vpack.c.bf16 %v2235_v54, %v2234_v49 }
 0x148   : > { %3020 = vmatpush3.bf16.msk.msra.mxu0 %vm3293_vm3, %v3015_v37  ;;  %2695 = vmatprep.mubr.msk.f32.mxu0 %vm336_vm0, %v3244_v0 }
 0x149   : > { %3022 = vmatprep.subr.bf16.mxu0 %v3021_v40 }
 0x14b   : > { %2696 = vmatmul.mubr.msk.f32.vlgmr.msra.gmra.mrb[24].mxu0 %vm336_vm0, %v3246_v1 }
 0x14c   : > { %3024 = vmatpush3.bf16.msra.mxu0 %v3021_v40  ;;  %2698 = vmatprep.mubr.msk.f32.mxu0 %vm336_vm0, %v3248_v2 }
 0x14d   : > { %3026 = vmatprep.subr.bf16.mxu0 %v3025_v43 }
 0x14f   : > { %2699 = vmatmul.mubr.msk.f32.gmra.mrb[26].mxu0 %vm336_vm0, %v3252_v4 }
 0x150   : > { %3028 = vmatpush3.bf16.msra.mxu0 %v3025_v43  ;;  %2701 = vmatprep.mubr.msk.f32.mxu0 %vm336_vm0, %v3262_v6 }
 0x151   : > { %3030 = vmatprep.subr.bf16.mxu0 %v3029_v48 }
 0x153   : > { %2702 = vmatmul.mubr.msk.f32.gmra.mrb[28].mxu0 %vm336_vm0, %v3264_v7 }
 0x154   : > { %3032 = vmatpush3.bf16.msra.mxu0 %v3029_v48  ;;  %2704 = vmatprep.mubr.msk.f32.mxu0 %vm336_vm0, %v3273_v10 }
 0x155   : > { %3034 = vmatprep.subr.bf16.mxu0 %v3033_v57 }
 0x157   : > { %2705 = vmatmul.mubr.msk.f32.gmra.mrb[30].mxu0 %vm336_vm0, %v3275_v11 }
 0x158   : > { %3036 = vmatpush3.bf16.msra.mxu0 %v3033_v57  ;;  %2707 = vmatprep.mubr.msk.f32.mxu0 %vm336_vm0, %v3281_v13 }
 0x159   : > { %3038 = vmatprep.subr.bf16.mxu0 %v3037_v60 }
 0x15b   : > { %2708 = vmatmul.mubr.msk.f32.gmra.mrb[32].mxu0 %vm336_vm0, %v3283_v14 }
 0x15c   : > { %3040 = vmatpush3.bf16.msra.mxu0 %v3037_v60  ;;  %2710 = vmatprep.mubr.msk.f32.mxu0 %vm336_vm0, %v3287_v16 }
 0x15d   : > { %3043 = vmatprep.subr.msk.bf16.mxu0 %vm3293_vm3, %v3041_v63 }
 0x15f   : > { %2711 = vmatmul.mubr.msk.f32.gmra.mrb[34].mxu0 %vm336_vm0, %v3289_v17 }
 0x160   : > { %3046 = vmatpush3.bf16.msk.msra.mxu0 %vm3293_vm3, %v3041_v63 }
 0x1ee   : > { %v2613_v3 = vpop.f32.mrb[12].mxu0 }
 0x1ef   : > { %v631_v5 = vmul.f32 2.0, %v2613_v3  ;;  %v571_v9 = vpop.f32.mrb[13].mxu0 }
 0x1f0   : > { %v630_v12 = vmul.f32 2.0, %v571_v9 }
 0x1f1   : > { %v643_v33 = vsub.f32 %v631_v5, %v3246_v1 }
 0x1f2   : > { %v642_v15 = vsub.f32 %v630_v12, %v3244_v0  ;;  %v2616_v18 = vpop.f32.mrb[14].mxu0 }
 0x1f3   : > { %v633_v36 = vmul.f32 2.0, %v2616_v18  ;;  %v581_v39 = vpop.f32.mrb[15].mxu0 }
 0x1f4   : > { %v632_v42 = vmul.f32 2.0, %v581_v39  ;;  %2737 = vmatprep.mubr.msk.f32.mxu0 %vm336_vm0, %v642_v15 }
 0x1f5   : > { %2738 = vmatmul.mubr.msk.f32.vlgmr.msra.gmra.mrb[24].mxu0 %vm336_vm0, %v643_v33  ;;  %v645_v32 = vsub.f32 %v633_v36, %v3252_v4 }
 0x1f6   : > { %v644_v45 = vsub.f32 %v632_v42, %v3248_v2  ;;  %v2619_v46 = vpop.f32.mrb[16].mxu0 }
 0x1f7   : > { %v635_v47 = vmul.f32 2.0, %v2619_v46  ;;  %v591_v31 = vpop.f32.mrb[17].mxu0 }
 0x1f8   : > { %v634_v35 = vmul.f32 2.0, %v591_v31  ;;  %2740 = vmatprep.mubr.msk.f32.mxu0 %vm336_vm0, %v644_v45 }
 0x1f9   : > { %2741 = vmatmul.mubr.msk.f32.gmra.mrb[26].mxu0 %vm336_vm0, %v645_v32  ;;  %v647_v50 = vsub.f32 %v635_v47, %v3264_v7 }
 0x1fa   : > { %v646_v0 = vsub.f32 %v634_v35, %v3262_v6  ;;  %v2622_v1 = vpop.f32.mrb[18].mxu0 }
 0x1fb   : > { %v637_v34 = vmul.f32 2.0, %v2622_v1  ;;  %v601_v38 = vpop.f32.mrb[19].mxu0 }
 0x1fc   : > { %v636_v51 = vmul.f32 2.0, %v601_v38  ;;  %2743 = vmatprep.mubr.msk.f32.mxu0 %vm336_vm0, %v646_v0 }
 0x1fd   : > { %2744 = vmatmul.mubr.msk.f32.gmra.mrb[28].mxu0 %vm336_vm0, %v647_v50  ;;  %v649_v37 = vsub.f32 %v637_v34, %v3275_v11 }
 0x1fe   : > { %v648_v2 = vsub.f32 %v636_v51, %v3273_v10  ;;  %v2625_v4 = vpop.f32.mrb[20].mxu0 }
 0x1ff   : > { %v639_v41 = vmul.f32 2.0, %v2625_v4  ;;  %v611_v52 = vpop.f32.mrb[21].mxu0 }
 0x200   : > { %v638_v40 = vmul.f32 2.0, %v611_v52  ;;  %2746 = vmatprep.mubr.msk.f32.mxu0 %vm336_vm0, %v648_v2 }
 0x201   : > { %2747 = vmatmul.mubr.msk.f32.gmra.mrb[30].mxu0 %vm336_vm0, %v649_v37  ;;  %v651_v44 = vsub.f32 %v639_v41, %v3283_v14 }
 0x202   : > { %v650_v6 = vsub.f32 %v638_v40, %v3281_v13  ;;  %v2628_v7 = vpop.f32.mrb[22].mxu0  ;;  %v2255_v13 = vld [vmem:[%s3874_s3] ss:$0 sm:$0xff] }
 0x203   : > { %v641_v53 = vmul.f32 2.0, %v2628_v7  ;;  %v621_v43 = vpop.f32.mrb[23].mxu0 }
 0x204   : > { %v640_v49 = vmul.f32 2.0, %v621_v43  ;;  %2749 = vmatprep.mubr.msk.f32.mxu0 %vm336_vm0, %v650_v6 }
 0x205   : > { %2750 = vmatmul.mubr.msk.f32.gmra.mrb[32].mxu0 %vm336_vm0, %v651_v44  ;;  %v653_v11 = vsub.f32 %v641_v53, %v3289_v17 }
 0x206   : > { %v652_v10 = vsub.f32 %v640_v49, %v3287_v16 }
 0x208   : > { %2752 = vmatprep.mubr.msk.f32.mxu0 %vm336_vm0, %v652_v10 }
 0x209   : > { %2753 = vmatmul.mubr.msk.f32.gmra.mrb[34].mxu0 %vm336_vm0, %v653_v11 }
 0x2c8   : > { %v2739_v14 = vpop.f32.mrb[24].mxu0 }
 0x2c9   : > { %v1202_v16 = vadd.f32 %v2739_v14, %v2255_v13  ;;  %v1123_v17 = vpop.f32.mrb[25].mxu0 }
 0x2ca   : > { %v1201_v54 = vadd.f32 %v2255_v13, %v1123_v17 }
 0x2cb   : > { %1215 = vst.msk [vmem:[%s3619_s23 + $0x8] sm:$0xff] %vm1213_vm4, %v1202_v16  ;;  %v3623_v48 = vmax.f32 %v1202_v16, 0.0 }
 0x2cc   : > { %1214 = vst.msk [vmem:[%s3619_s23] sm:$0xff] %vm1213_vm4, %v1201_v54  ;;  %v3627_v55 = vmax.f32 %v1201_v54, 0.0  ;;  %v2742_v56 = vpop.f32.mrb[26].mxu0 }
 0x2cd   : > { %v1204_v57 = vadd.f32 %v2742_v56, %v2255_v13  ;;  %v1133_v58 = vpop.f32.mrb[27].mxu0 }
 0x2ce   : > { %v1203_v59 = vadd.f32 %v2255_v13, %v1133_v58  ;;  %v3047_v60 = vpack.c.bf16 %v3623_v48, %v3627_v55  ;;  %v2283_v58 = vld [vmem:[%s3875_s4 + $0x28] sm:$0xff] }
 0x2cf   : > { %1217 = vst.msk [vmem:[%s3619_s23 + $0x18] sm:$0xff] %vm1213_vm4, %v1204_v57  ;;  %v3633_v61 = vmax.f32 %v1204_v57, 0.0  ;;  %v2282_v57 = vld [vmem:[%s3875_s4 + $0x20] sm:$0xff] }
 0x2d0   : > { %1216 = vst.msk [vmem:[%s3619_s23 + $0x10] sm:$0xff] %vm1213_vm4, %v1203_v59  ;;  %v3637_v62 = vmax.f32 %v1203_v59, 0.0  ;;  %v2745_v63 = vpop.f32.mrb[28].mxu0  ;;  %3048 = vmatprep.subr.bf16.mxu1 %v3047_v60 }
 0x2d1   : > { %v1206_v3 = vadd.f32 %v2745_v63, %v2255_v13  ;;  %v1143_v5 = vpop.f32.mrb[29].mxu0  ;;  %3050 = vmatpush3.bf16.msra.mxu1 %v3047_v60 }
 0x2d2   : > { %v1205_v9 = vadd.f32 %v2255_v13, %v1143_v5  ;;  %v3051_v12 = vpack.c.bf16 %v3633_v61, %v3637_v62  ;;  %v2284_v5 = vld [vmem:[%s3875_s4 + $0x30] sm:$0xff] }
 0x2d3   : > { %1219 = vst.msk [vmem:[%s3619_s23 + $0x28] sm:$0xff] %vm1213_vm4, %v1206_v3  ;;  %v3643_v15 = vmax.f32 %v1206_v3, 0.0  ;;  %v3099_v3 = vpack.c.bf16 %v2283_v58, %v2282_v57 }
 0x2d4   : > { %1218 = vst.msk [vmem:[%s3619_s23 + $0x20] sm:$0xff] %vm1213_vm4, %v1205_v9  ;;  %v3647_v18 = vmax.f32 %v1205_v9, 0.0  ;;  %v2748_v33 = vpop.f32.mrb[30].mxu0  ;;  %3052 = vmatprep.subr.bf16.mxu1 %v3051_v12  ;;  %v2285_v9 = vld [vmem:[%s3875_s4 + $0x38] sm:$0xff] }
 0x2d5   : > { %v1208_v36 = vadd.f32 %v2748_v33, %v2255_v13  ;;  %v1153_v39 = vpop.f32.mrb[31].mxu0  ;;  %3054 = vmatpush3.bf16.msra.mxu1 %v3051_v12  ;;  %v3103_v12 = vpack.c.bf16 %v2285_v9, %v2284_v5  ;;  %v1519_v33 = vld [vmem:[%s3875_s4] sm:$0xff] }
 0x2d6   : > { %v1207_v42 = vadd.f32 %v2255_v13, %v1153_v39  ;;  %v3055_v45 = vpack.c.bf16 %v3643_v15, %v3647_v18 }
 0x2d7   : > { %1221 = vst.msk [vmem:[%s3619_s23 + $0x38] sm:$0xff] %vm1213_vm4, %v1208_v36  ;;  %v3653_v46 = vmax.f32 %v1208_v36, 0.0  ;;  %v1520_v36 = vld [vmem:[%s3875_s4 + $0x8] sm:$0xff] }
 0x2d8   : > { %1220 = vst.msk [vmem:[%s3619_s23 + $0x30] sm:$0xff] %vm1213_vm4, %v1207_v42  ;;  %v3657_v32 = vmax.f32 %v1207_v42, 0.0  ;;  %v2751_v47 = vpop.f32.mrb[32].mxu0  ;;  %3056 = vmatprep.subr.bf16.mxu1 %v3055_v45  ;;  %v3107_v19 = vpack.c.bf16 %v1520_v36, %v1519_v33 }
 0x2d9   : > { %v1210_v31 = vadd.f32 %v2751_v47, %v2255_v13  ;;  %v1163_v35 = vpop.f32.mrb[33].mxu0  ;;  %3058 = vmatpush3.bf16.msra.mxu1 %v3055_v45 }
 0x2da   : > { %v1209_v0 = vadd.f32 %v2255_v13, %v1163_v35  ;;  %v3059_v1 = vpack.c.bf16 %v3653_v46, %v3657_v32 }
 0x2db   : > { %1223 = vst.msk [vmem:[%s3619_s23 + $0x48] sm:$0xff] %vm1213_vm4, %v1210_v31  ;;  %v3663_v50 = vmax.f32 %v1210_v31, 0.0 }
 0x2dc   : > { %1222 = vst.msk [vmem:[%s3619_s23 + $0x40] sm:$0xff] %vm1213_vm4, %v1209_v0  ;;  %v3667_v34 = vmax.f32 %v1209_v0, 0.0  ;;  %v2754_v38 = vpop.f32.mrb[34].mxu0  ;;  %3060 = vmatprep.subr.bf16.mxu1 %v3059_v1 }
 0x2dd   : > { %v1212_v51 = vadd.f32 %v2754_v38, %v2255_v13  ;;  %v1173_v2 = vpop.f32.mrb[35].mxu0  ;;  %3062 = vmatpush3.bf16.msra.mxu1 %v3059_v1 }
 0x2de   : > { %v1211_v4 = vadd.f32 %v2255_v13, %v1173_v2  ;;  %v3063_v37 = vpack.c.bf16 %v3663_v50, %v3667_v34 }
 0x2df   : > { %1226 = vst.msk [vmem:[%s3619_s23 + $0x58] sm:$0x3] %vm1225_vm5, %v1212_v51  ;;  %v3673_v41 = vmax.f32 %v1212_v51, 0.0 }
 0x2e0   : > { %1224 = vst.msk [vmem:[%s3619_s23 + $0x50] sm:$0xff] %vm1213_vm4, %v1211_v4  ;;  %v3677_v52 = vmax.f32 %v1211_v4, 0.0  ;;  %3064 = vmatprep.subr.bf16.mxu1 %v3063_v37 }
 0x2e1   : > { %3066 = vmatpush3.bf16.msra.mxu1 %v3063_v37 }
 0x2e2   : > { %v3067_v40 = vpack.c.bf16 %v3673_v41, %v3677_v52 }
 0x2e4   : > { %3069 = vmatprep.subr.msk.bf16.mxu1 %vm3293_vm3, %v3067_v40 }
 0x2e5   : > { %3072 = vmatpush3.bf16.msk.msra.mxu1 %vm3293_vm3, %v3067_v40 }
 0x2e8   : > { %2780 = vmatmul.mubr.msk.f32.vlgmr.msra.gmra.mrb[0].mxu1 %vm336_vm0, %v3302_v20 }
 0x2e9   : > { %2782 = vmatprep.mubr.msk.f32.mxu1 %vm336_vm0, %v3305_v21 }
 0x2ec   : > { %2783 = vmatmul.mubr.msk.f32.gmra.mrb[2].mxu1 %vm336_vm0, %v3312_v22 }
 0x2ed   : > { %2785 = vmatprep.mubr.msk.f32.mxu1 %vm336_vm0, %v3315_v23 }
 0x2f0   : > { %2786 = vmatmul.mubr.msk.f32.gmra.mrb[4].mxu1 %vm336_vm0, %v3322_v24 }
 0x2f1   : > { %2788 = vmatprep.mubr.msk.f32.mxu1 %vm336_vm0, %v3325_v25 }
 0x2f4   : > { %2789 = vmatmul.mubr.msk.f32.gmra.mrb[6].mxu1 %vm336_vm0, %v3332_v26 }
 0x2f5   : > { %2791 = vmatprep.mubr.msk.f32.mxu1 %vm336_vm0, %v3335_v27 }
 0x2f8   : > { %2792 = vmatmul.mubr.msk.f32.gmra.mrb[8].mxu1 %vm336_vm0, %v3342_v28 }
 0x2f9   : > { %2794 = vmatprep.mubr.msk.f32.mxu1 %vm336_vm0, %v3345_v29 }
 0x2fc   : > { %2795 = vmatmul.mubr.msk.f32.gmra.mrb[10].mxu1 %vm336_vm0, %v3352_v30 }
 0x2fd   : > { %2821 = vmatprep.mubr.msk.f32.mxu1 %vm336_vm0, %v3267_v8 }
 0x3bb   : > { %v2781_v6 = vpop.f32.mrb[0].mxu1 }
 0x3bc   : > { %v1308_v7 = vpop.f32.mrb[1].mxu1 }
 0x3bd   : > { %v3073_v44 = vpack.c.bf16 %v2781_v6, %v1308_v7 }
 0x3bf   : > { %v3709_v53 = vpop.f32.mrb[2].mxu1  ;;  %3074 = vmatprep.subr.bf16.mxu1 %v3073_v44 }
 0x3c0   : > { %v1318_v43 = vpop.f32.mrb[3].mxu1  ;;  %3076 = vmatpush3.bf16.msra.mxu1 %v3073_v44 }
 0x3c1   : > { %v3077_v49 = vpack.c.bf16 %v3709_v53, %v1318_v43 }
 0x3c3   : > { %v2787_v10 = vpop.f32.mrb[4].mxu1  ;;  %3078 = vmatprep.subr.bf16.mxu1 %v3077_v49 }
 0x3c4   : > { %v1328_v11 = vpop.f32.mrb[5].mxu1  ;;  %3080 = vmatpush3.bf16.msra.mxu1 %v3077_v49 }
 0x3c5   : > { %v3081_v13 = vpack.c.bf16 %v2787_v10, %v1328_v11 }
 0x3c7   : > { %v2790_v14 = vpop.f32.mrb[6].mxu1  ;;  %3082 = vmatprep.subr.bf16.mxu1 %v3081_v13 }
 0x3c8   : > { %v1338_v16 = vpop.f32.mrb[7].mxu1  ;;  %3084 = vmatpush3.bf16.msra.mxu1 %v3081_v13 }
 0x3c9   : > { %v3085_v8 = vpack.c.bf16 %v2790_v14, %v1338_v16 }
 0x3cb   : > { %v2793_v17 = vpop.f32.mrb[8].mxu1  ;;  %3086 = vmatprep.subr.bf16.mxu1 %v3085_v8 }
 0x3cc   : > { %v1348_v54 = vpop.f32.mrb[9].mxu1  ;;  %3088 = vmatpush3.bf16.msra.mxu1 %v3085_v8 }
 0x3cd   : > { %v3089_v56 = vpack.c.bf16 %v2793_v17, %v1348_v54 }
 0x3cf   : > { %v2796_v59 = vpop.f32.mrb[10].mxu1  ;;  %3090 = vmatprep.subr.bf16.mxu1 %v3089_v56 }
 0x3d0   : > { %v1358_v60 = vpop.f32.mrb[11].mxu1  ;;  %3092 = vmatpush3.bf16.msra.mxu1 %v3089_v56 }
 0x3d1   : > { %v3093_v63 = vpack.c.bf16 %v2796_v59, %v1358_v60 }
 0x3d3   : > { %3095 = vmatprep.subr.msk.bf16.mxu1 %vm3293_vm3, %v3093_v63 }
 0x3d4   : > { %3098 = vmatpush3.bf16.msk.msra.mxu1 %vm3293_vm3, %v3093_v63 }
 0x3d5   : > { %3100 = vmatprep.subr.bf16.mxu1 %v3099_v3 }
 0x3d7   : > { %2822 = vmatmul.mubr.msk.f32.vlgmr.msra.gmra.mrb[12].mxu1 %vm336_vm0, %v3302_v20  ;;  %v1521_v20 = vld [vmem:[%s3875_s4 + $0x10] sm:$0xff] }
 0x3d8   : > { %2824 = vmatprep.mubr.msk.f32.mxu1 %vm336_vm0, %v3305_v21  ;;  %3102 = vmatpush3.bf16.msra.mxu1 %v3099_v3  ;;  %v1522_v21 = vld [vmem:[%s3875_s4 + $0x18] sm:$0xff] }
 0x3d9   : > { %3104 = vmatprep.subr.bf16.mxu1 %v3103_v12 }
 0x3db   : > { %2825 = vmatmul.mubr.msk.f32.gmra.mrb[14].mxu1 %vm336_vm0, %v3312_v22  ;;  %v3111_v22 = vpack.c.bf16 %v1522_v21, %v1521_v20 }
 0x3dc   : > { %2827 = vmatprep.mubr.msk.f32.mxu1 %vm336_vm0, %v3315_v23  ;;  %3106 = vmatpush3.bf16.msra.mxu1 %v3103_v12  ;;  %v2310_v23 = vld [vmem:[%s3875_s4 + $0x40] sm:$0xff] }
 0x3dd   : > { %3108 = vmatprep.subr.bf16.mxu1 %v3107_v19 }
 0x3df   : > { %2828 = vmatmul.mubr.msk.f32.gmra.mrb[16].mxu1 %vm336_vm0, %v3322_v24  ;;  %v2311_v24 = vld [vmem:[%s3875_s4 + $0x48] sm:$0xff] }
 0x3e0   : > { %2830 = vmatprep.mubr.msk.f32.mxu1 %vm336_vm0, %v3325_v25  ;;  %v3115_v25 = vpack.c.bf16 %v2311_v24, %v2310_v23 }
 0x3e3   : > { %2831 = vmatmul.mubr.msk.f32.gmra.mrb[18].mxu1 %vm336_vm0, %v3332_v26  ;;  %v2312_v26 = vld [vmem:[%s3875_s4 + $0x50] sm:$0xff] }
 0x3e4   : > { %2833 = vmatprep.mubr.msk.f32.mxu1 %vm336_vm0, %v3335_v27  ;;  %v2313_v27 = vld [vmem:[%s3875_s4 + $0x58] sm:$0xff] }
 0x3e7   : > { %2834 = vmatmul.mubr.msk.f32.gmra.mrb[20].mxu1 %vm336_vm0, %v3342_v28  ;;  %v3119_v28 = vpack.c.bf16 %v2313_v27, %v2312_v26 }
 0x3e8   : > { %2836 = vmatprep.mubr.msk.f32.mxu1 %vm336_vm0, %v3345_v29 }
 0x3eb   : > { %2837 = vmatmul.mubr.msk.f32.gmra.mrb[22].mxu1 %vm336_vm0, %v3352_v30 }
 0x3ec   : > { %2847 = vmatprep.mubr.msk.f32.mxu1 %vm1213_vm4, %v1308_v7 }
 0x3ef   : > { %2848 = vmatmul.mubr.msk.f32.vlgmr.msra.gmra.mrb[24].mxu1 %vm1213_vm4, %v2781_v6 }
 0x3f0   : > { %2850 = vmatprep.mubr.msk.f32.mxu1 %vm1213_vm4, %v1318_v43  ;;  %3110 = vmatpush3.bf16.msra.mxu1 %v3107_v19 }
 0x3f1   : > { %3112 = vmatprep.subr.bf16.mxu1 %v3111_v22 }
 0x3f3   : > { %2851 = vmatmul.mubr.msk.f32.gmra.mrb[26].mxu1 %vm1213_vm4, %v3709_v53 }
 0x3f4   : > { %2853 = vmatprep.mubr.msk.f32.mxu1 %vm1213_vm4, %v1328_v11  ;;  %3114 = vmatpush3.bf16.msra.mxu1 %v3111_v22 }
 0x3f5   : > { %3116 = vmatprep.subr.bf16.mxu1 %v3115_v25 }
 0x3f7   : > { %2854 = vmatmul.mubr.msk.f32.gmra.mrb[28].mxu1 %vm1213_vm4, %v2787_v10 }
 0x3f8   : > { %2856 = vmatprep.mubr.msk.f32.mxu1 %vm1213_vm4, %v1338_v16 }
 0x3fb   : > { %2857 = vmatmul.mubr.msk.f32.gmra.mrb[30].mxu1 %vm1213_vm4, %v2790_v14 }
 0x3fc   : > { %2859 = vmatprep.mubr.msk.f32.mxu1 %vm1213_vm4, %v1348_v54 }
 0x3ff   : > { %2860 = vmatmul.mubr.msk.f32.gmra.mrb[32].mxu1 %vm1213_vm4, %v2793_v17 }
 0x400   : > { %2862 = vmatprep.mubr.msk.f32.mxu1 %vm1213_vm4, %v1358_v60 }
 0x403   : > { %2863 = vmatmul.mubr.msk.f32.gmra.mrb[34].mxu1 %vm1213_vm4, %v2796_v59 }
 0x404   : > { %2873 = vmatprep.mubr.msk.f32.mxu1 %vm1213_vm4, %v3627_v55 }
 0x407   : > { %2874 = vmatmul.mubr.msk.f32.vlgmr.msra.gmra.mrb[24].mxu1 %vm1213_vm4, %v3623_v48 }
 0x408   : > { %2876 = vmatprep.mubr.msk.f32.mxu1 %vm1213_vm4, %v3637_v62  ;;  %3118 = vmatpush3.bf16.msra.mxu1 %v3115_v25 }
 0x409   : > { %3120 = vmatprep.subr.bf16.mxu1 %v3119_v28 }
 0x40b   : > { %2877 = vmatmul.mubr.msk.f32.gmra.mrb[26].mxu1 %vm1213_vm4, %v3633_v61 }
 0x40c   : > { %2879 = vmatprep.mubr.msk.f32.mxu1 %vm1213_vm4, %v3647_v18  ;;  %3122 = vmatpush3.bf16.msra.mxu1 %v3119_v28 }
 0x40f   : > { %2880 = vmatmul.mubr.msk.f32.gmra.mrb[28].mxu1 %vm1213_vm4, %v3643_v15 }
 0x410   : > { %2882 = vmatprep.mubr.msk.f32.mxu1 %vm1213_vm4, %v3657_v32 }
 0x413   : > { %2883 = vmatmul.mubr.msk.f32.gmra.mrb[30].mxu1 %vm1213_vm4, %v3653_v46 }
 0x414   : > { %2885 = vmatprep.mubr.msk.f32.mxu1 %vm1213_vm4, %v3667_v34 }
 0x417   : > { %2886 = vmatmul.mubr.msk.f32.gmra.mrb[32].mxu1 %vm1213_vm4, %v3663_v50 }
 0x418   : > { %2888 = vmatprep.mubr.msk.f32.mxu1 %vm1213_vm4, %v3677_v52 }
 0x41b   : > { %2889 = vmatmul.mubr.msk.f32.gmra.mrb[34].mxu1 %vm1213_vm4, %v3673_v41 }
 0x4aa   : > { %v2823_v29 = vpop.f32.mrb[12].mxu1 }
 0x4ab   : > { %v1496_v30 = vmul.f32 2.0, %v2823_v29  ;;  %v1436_v39 = vpop.f32.mrb[13].mxu1 }
 0x4ac   : > { %v1495_v42 = vmul.f32 2.0, %v1436_v39 }
 0x4ad   : > { %v1508_v31 = vsub.f32 %v1496_v30, %v3623_v48 }
 0x4ae   : > { %v1507_v45 = vsub.f32 %v1495_v42, %v3627_v55  ;;  %v2826_v47 = vpop.f32.mrb[14].mxu1 }
 0x4af   : > { %v1498_v35 = vmul.f32 2.0, %v2826_v47  ;;  %v1446_v0 = vpop.f32.mrb[15].mxu1 }
 0x4b0   : > { %v1497_v1 = vmul.f32 2.0, %v1446_v0  ;;  %2899 = vmatprep.mubr.msk.f32.mxu1 %vm1213_vm4, %v1507_v45 }
 0x4b1   : > { %2900 = vmatmul.mubr.msk.f32.vlgmr.msra.gmra.mrb[24].mxu1 %vm1213_vm4, %v1508_v31  ;;  %v1510_v2 = vsub.f32 %v1498_v35, %v3633_v61 }
 0x4b2   : > { %v1509_v38 = vsub.f32 %v1497_v1, %v3637_v62  ;;  %v2829_v51 = vpop.f32.mrb[16].mxu1 }
 0x4b3   : > { %v1500_v4 = vmul.f32 2.0, %v2829_v51  ;;  %v1456_v37 = vpop.f32.mrb[17].mxu1 }
 0x4b4   : > { %v1499_v40 = vmul.f32 2.0, %v1456_v37  ;;  %2902 = vmatprep.mubr.msk.f32.mxu1 %vm1213_vm4, %v1509_v38 }
 0x4b5   : > { %2903 = vmatmul.mubr.msk.f32.gmra.mrb[26].mxu1 %vm1213_vm4, %v1510_v2  ;;  %v1512_v6 = vsub.f32 %v1500_v4, %v3643_v15 }
 0x4b6   : > { %v1511_v48 = vsub.f32 %v1499_v40, %v3647_v18  ;;  %v2832_v55 = vpop.f32.mrb[18].mxu1 }
 0x4b7   : > { %v1502_v7 = vmul.f32 2.0, %v2832_v55  ;;  %v1466_v44 = vpop.f32.mrb[19].mxu1 }
 0x4b8   : > { %v1501_v53 = vmul.f32 2.0, %v1466_v44  ;;  %2905 = vmatprep.mubr.msk.f32.mxu1 %vm1213_vm4, %v1511_v48 }
 0x4b9   : > { %2906 = vmatmul.mubr.msk.f32.gmra.mrb[28].mxu1 %vm1213_vm4, %v1512_v6  ;;  %v1514_v43 = vsub.f32 %v1502_v7, %v3653_v46 }
 0x4ba   : > { %v1513_v61 = vsub.f32 %v1501_v53, %v3657_v32  ;;  %v2835_v62 = vpop.f32.mrb[20].mxu1 }
 0x4bb   : > { %v1504_v49 = vmul.f32 2.0, %v2835_v62  ;;  %v1476_v10 = vpop.f32.mrb[21].mxu1 }
 0x4bc   : > { %v1503_v11 = vmul.f32 2.0, %v1476_v10  ;;  %2908 = vmatprep.mubr.msk.f32.mxu1 %vm1213_vm4, %v1513_v61 }
 0x4bd   : > { %2909 = vmatmul.mubr.msk.f32.gmra.mrb[30].mxu1 %vm1213_vm4, %v1514_v43  ;;  %v1516_v13 = vsub.f32 %v1504_v49, %v3663_v50 }
 0x4be   : > { %v1515_v15 = vsub.f32 %v1503_v11, %v3667_v34  ;;  %v2838_v18 = vpop.f32.mrb[22].mxu1  ;;  %v2326_v34 = vld [vmem:[%s3876_s5] ss:$0 sm:$0xff] }
 0x4bf   : > { %v1506_v14 = vmul.f32 2.0, %v2838_v18  ;;  %v1486_v16 = vpop.f32.mrb[23].mxu1 }
 0x4c0   : > { %v1505_v8 = vmul.f32 2.0, %v1486_v16  ;;  %2911 = vmatprep.mubr.msk.f32.mxu1 %vm1213_vm4, %v1515_v15 }
 0x4c1   : > { %2912 = vmatmul.mubr.msk.f32.gmra.mrb[32].mxu1 %vm1213_vm4, %v1516_v13  ;;  %v1518_v32 = vsub.f32 %v1506_v14, %v3673_v41 }
 0x4c2   : > { %v1517_v46 = vsub.f32 %v1505_v8, %v3677_v52 }
 0x4c4   : > { %2914 = vmatprep.mubr.msk.f32.mxu1 %vm1213_vm4, %v1517_v46 }
 0x4c5   : > { %2915 = vmatmul.mubr.msk.f32.gmra.mrb[34].mxu1 %vm1213_vm4, %v1518_v32 }
 0x584   : > { %v2901_v50 = vpop.f32.mrb[24].mxu1 }
 0x585   : > { %v2034_v41 = vadd.f32 %v2901_v50, %v2326_v34  ;;  %v1955_v52 = vpop.f32.mrb[25].mxu1 }
 0x586   : > { %v2033_v17 = vadd.f32 %v2326_v34, %v1955_v52 }
 0x587   : > { %2046 = vst.msk [vmem:[%s3842_s10 + $0x8] sm:$0xff] %vm1213_vm4, %v2034_v41 }
 0x588   : > { %2045 = vst.msk [vmem:[%s3842_s10] sm:$0xff] %vm1213_vm4, %v2033_v17  ;;  %v2904_v54 = vpop.f32.mrb[26].mxu1 }
 0x589   : > { %v2036_v56 = vadd.f32 %v2904_v54, %v2326_v34  ;;  %v1965_v57 = vpop.f32.mrb[27].mxu1 }
 0x58a   : > { %v2035_v58 = vadd.f32 %v2326_v34, %v1965_v57 }
 0x58b   : > { %2048 = vst.msk [vmem:[%s3842_s10 + $0x18] sm:$0xff] %vm1213_vm4, %v2036_v56 }
 0x58c   : > { %2047 = vst.msk [vmem:[%s3842_s10 + $0x10] sm:$0xff] %vm1213_vm4, %v2035_v58  ;;  %v2907_v59 = vpop.f32.mrb[28].mxu1 }
 0x58d   : > { %v2038_v60 = vadd.f32 %v2907_v59, %v2326_v34  ;;  %v1975_v63 = vpop.f32.mrb[29].mxu1 }
 0x58e   : > { %v2037_v3 = vadd.f32 %v2326_v34, %v1975_v63 }
 0x58f   : > { %2050 = vst.msk [vmem:[%s3842_s10 + $0x28] sm:$0xff] %vm1213_vm4, %v2038_v60 }
 0x590   : > { %2049 = vst.msk [vmem:[%s3842_s10 + $0x20] sm:$0xff] %vm1213_vm4, %v2037_v3  ;;  %v2910_v5 = vpop.f32.mrb[30].mxu1 }
 0x591   : > { %v2040_v9 = vadd.f32 %v2910_v5, %v2326_v34  ;;  %v1985_v12 = vpop.f32.mrb[31].mxu1 }
 0x592   : > { %v2039_v33 = vadd.f32 %v2326_v34, %v1985_v12 }
 0x593   : > { %2052 = vst.msk [vmem:[%s3842_s10 + $0x38] sm:$0xff] %vm1213_vm4, %v2040_v9 }
 0x594   : > { %2051 = vst.msk [vmem:[%s3842_s10 + $0x30] sm:$0xff] %vm1213_vm4, %v2039_v33  ;;  %v2913_v36 = vpop.f32.mrb[32].mxu1 }
 0x595   : > { %v2042_v19 = vadd.f32 %v2913_v36, %v2326_v34  ;;  %v1995_v20 = vpop.f32.mrb[33].mxu1 }
 0x596   : > { %v2041_v21 = vadd.f32 %v2326_v34, %v1995_v20 }
 0x597   : > { %2054 = vst.msk [vmem:[%s3842_s10 + $0x48] sm:$0xff] %vm1213_vm4, %v2042_v19 }
 0x598   : > { %2053 = vst.msk [vmem:[%s3842_s10 + $0x40] sm:$0xff] %vm1213_vm4, %v2041_v21  ;;  %v2916_v22 = vpop.f32.mrb[34].mxu1 }
 0x599   : > { %v2044_v23 = vadd.f32 %v2916_v22, %v2326_v34  ;;  %v2005_v24 = vpop.f32.mrb[35].mxu1 }
 0x59a   : > { %v2043_v25 = vadd.f32 %v2326_v34, %v2005_v24 }
 0x59b   : > { %2056 = vst.msk [vmem:[%s3842_s10 + $0x58] sm:$0x3] %vm1225_vm5, %v2044_v23 }
 0x59c   : > { %2055 = vst.msk [vmem:[%s3842_s10 + $0x50] sm:$0xff] %vm1213_vm4, %v2043_v25 }
 0x59d PF: > { %s18_s24 = sadd.s32 1, %s3187_s24  }
 0x59e   : > { %p15_p4 = scmp.ge.s32.totalorder %s18_s24, 4  }
 0x5a0   :  { %17 = sbr.rel (!%p15_p4) target bundleno = 1 (0x1), region = 93 }

</bundles_post_ra>
